<compile_context>
chip_gen: v5e
topology: v5e:2x2
jax: 0.10.0
libtpu: 0.0.40
codegen_flags: <defaults>
</compile_context>

<pallas_src>
import jax
import jax.numpy as jnp
from jax.experimental import pallas as pl
from jax.experimental.pallas import tpu as pltpu


def _round_up(n, m):
    return ((n + m - 1) // m) * m


def _two_layer_kernel(x_ref, w1t_ref, b1_ref, w2_ref, b2_ref, o_ref):
    # Layer 1: (TB, F) @ (F, H) on the MXU, f32 accumulate (W1 already transposed).
    h = jnp.dot(x_ref[...], w1t_ref[...], preferred_element_type=jnp.float32)
    h = jnp.maximum(h + b1_ref[...], 0.0)                      # bias (1, H) + ReLU (VPU)
    # Layer 2 (out_features == 1): VPU multiply + lane reduction, not an N=1 MXU matmul.
    logits = jnp.sum(h * w2_ref[...], axis=-1) + b2_ref[0]     # (TB,)
    probs = jax.nn.sigmoid(logits)                             # EUP
    o_ref[...] = probs.reshape(1, 1, -1).astype(o_ref.dtype)   # lane-dense store


def two_layer_net(x, w1, b1, w2, b2, *, batch_tile=512):
    """Forward pass of TwoLayerNet as a single Pallas kernel.

    x : (B, F) float32
    w1: (H, F) float32 (PyTorch layout), b1: (H,) float32
    w2: (1, H) float32,                  b2: (1,) float32
    returns (B, 1) float32
    """
    B, F = x.shape
    H = w1.shape[0]

    # One-time host-side layout prep.
    w1t = w1.T                                 # (F, H): MXU-natural RHS layout
    b1_row = b1.reshape(1, H).astype(jnp.float32)
    w2_row = w2.reshape(1, H).astype(jnp.float32)
    b2_s = b2.reshape(1).astype(jnp.float32)   # scalar -> SMEM

    # Batch tiling (pad B so the grid divides evenly; tail rows are discarded).
    tb = min(batch_tile, _round_up(B, 8))
    b_pad = _round_up(B, tb)
    if b_pad != B:
        x = jnp.pad(x, ((0, b_pad - B), (0, 0)))
    num_tiles = b_pad // tb

    out3 = pl.pallas_call(
        _two_layer_kernel,
        out_shape=jax.ShapeDtypeStruct((num_tiles, 1, tb), jnp.float32),
        grid=(num_tiles,),
        in_specs=[
            pl.BlockSpec((tb, F), lambda i: (i, 0)),               # streamed x tiles
            pl.BlockSpec((F, H), lambda i: (0, 0)),                # resident W1^T
            pl.BlockSpec((1, H), lambda i: (0, 0)),                # resident b1
            pl.BlockSpec((1, H), lambda i: (0, 0)),                # resident w2 row
            pl.BlockSpec(memory_space=pltpu.MemorySpace.SMEM),     # scalar b2
        ],
        out_specs=pl.BlockSpec((1, 1, tb), lambda i: (i, 0, 0)),   # lane-dense output
        compiler_params=pltpu.CompilerParams(
            dimension_semantics=("parallel",),      # split batch tiles across TCs (v7x)
            vmem_limit_bytes=32 * 1024 * 1024,      # safe on v5e/v6e/v7x for these tiles
        ),
    )(x, w1t, b1_row, w2_row, b2_s)

    return out3.reshape(b_pad, 1)[:B]


def _xavier_uniform(key, out_features, in_features):
    # Matches torch.nn.init.xavier_uniform_ (gain=1).
    bound = jnp.sqrt(6.0 / (in_features + out_features))
    return jax.random.uniform(
        key, (out_features, in_features), jnp.float32, minval=-bound, maxval=bound
    )


def _linear_bias_init(key, in_features, out_features):
    # Matches torch.nn.Linear default bias init: U(-1/sqrt(fan_in), 1/sqrt(fan_in)).
    bound = 1.0 / jnp.sqrt(jnp.float32(in_features))
    return jax.random.uniform(
        key, (out_features,), jnp.float32, minval=-bound, maxval=bound
    )


def _reference(x, w1, b1, w2, b2):
    h = jnp.maximum(x @ w1.T + b1, 0.0)
    return jax.nn.sigmoid(h @ w2.T + b2)


def _run_case(key, batch, input_size, hidden_size):
    k_x, k_w1, k_b1, k_w2, k_b2 = jax.random.split(key, 5)
    x = jax.random.normal(k_x, (batch, input_size), dtype=jnp.float32)
    w1 = _xavier_uniform(k_w1, hidden_size, input_size)
    b1 = _linear_bias_init(k_b1, input_size, hidden_size)
    w2 = _xavier_uniform(k_w2, 1, hidden_size)
    b2 = _linear_bias_init(k_b2, hidden_size, 1)

    out = jax.block_until_ready(two_layer_net(x, w1, b1, w2, b2))
    ref = _reference(x, w1, b1, w2, b2)
    assert out.shape == (batch, 1)
    assert jnp.allclose(out, ref, atol=1e-5, rtol=1e-5)


if __name__ == "__main__":
    key = jax.random.PRNGKey(0)
    k_small, k_big = jax.random.split(key, 2)

    # Small demo shapes consistent with the module defaults.
    _run_case(k_small, batch=8, input_size=16, hidden_size=8)
    # Exercise the multi-tile + padded-batch path.
    _run_case(k_big, batch=1037, input_size=64, hidden_size=8)

    print("KERNEL_OK")
</pallas_src>

<mosaic_0001>
module attributes {stable_mosaic.version = 11 : i64} {
  func.func @_two_layer_kernel(%arg0: i32, %arg1: memref<8x16xf32, #tpu.memory_space<vmem>>, %arg2: memref<16x8xf32, #tpu.memory_space<vmem>>, %arg3: memref<1x8xf32, #tpu.memory_space<vmem>>, %arg4: memref<1x8xf32, #tpu.memory_space<vmem>>, %arg5: memref<1xf32, #tpu.memory_space<smem>>, %arg6: memref<1x1x8xf32, #tpu.memory_space<vmem>>) attributes {dimension_semantics = [#tpu.dimension_semantics<parallel>], iteration_bounds = array<i64: 1>, scalar_prefetch = 0 : i64, scratch_operands = 0 : i64, tpu.core_type = #tpu.core_type<tc>, window_params = [{transform_indices = @transform_0, window_bounds = array<i64: 8, 16>}, {pipeline_mode = #tpu.pipeline_mode<synchronous>, transform_indices = @transform_1, window_bounds = array<i64: 16, 8>}, {pipeline_mode = #tpu.pipeline_mode<synchronous>, transform_indices = @transform_2, window_bounds = array<i64: 1, 8>}, {pipeline_mode = #tpu.pipeline_mode<synchronous>, transform_indices = @transform_3, window_bounds = array<i64: 1, 8>}, {transform_indices = @transform_4, window_bounds = array<i64: 1>}, {transform_indices = @transform_5, window_bounds = array<i64: 1, 1, 8>}]} {
    %c0 = arith.constant 0 : index
    %c0_0 = arith.constant 0 : index
    %0 = vector.load %arg1[%c0, %c0_0] : memref<8x16xf32, #tpu.memory_space<vmem>>, vector<8x16xf32>
    %c0_1 = arith.constant 0 : index
    %c0_2 = arith.constant 0 : index
    %1 = vector.load %arg2[%c0_1, %c0_2] : memref<16x8xf32, #tpu.memory_space<vmem>>, vector<16x8xf32>
    %cst = arith.constant dense<0.000000e+00> : vector<8x8xf32>
    %2 = tpu.matmul %0, %1, %cst {dimension_numbers = #tpu.dot_dimension_numbers<[1], [0], [0], [1], [0, 0, 1, 1], [], []>} : vector<8x16xf32>, vector<16x8xf32>, vector<8x8xf32> -> vector<8x8xf32>
    %c0_3 = arith.constant 0 : index
    %c0_4 = arith.constant 0 : index
    %3 = vector.load %arg3[%c0_3, %c0_4] : memref<1x8xf32, #tpu.memory_space<vmem>>, vector<1x8xf32>
    %4 = vector.broadcast %3 : vector<1x8xf32> to vector<8x8xf32>
    %5 = arith.addf %2, %4 : vector<8x8xf32>
    %cst_5 = arith.constant 0.000000e+00 : f32
    %6 = vector.broadcast %cst_5 : f32 to vector<8x8xf32>
    %7 = arith.maximumf %5, %6 : vector<8x8xf32>
    %c0_6 = arith.constant 0 : index
    %c0_7 = arith.constant 0 : index
    %8 = vector.load %arg4[%c0_6, %c0_7] : memref<1x8xf32, #tpu.memory_space<vmem>>, vector<1x8xf32>
    %9 = vector.broadcast %8 : vector<1x8xf32> to vector<8x8xf32>
    %10 = arith.mulf %7, %9 : vector<8x8xf32>
    %cst_8 = arith.constant dense<0.000000e+00> : vector<8xf32>
    %11 = vector.multi_reduction <add>, %10, %cst_8 [1] : vector<8x8xf32> to vector<8xf32>
    %c0_9 = arith.constant 0 : index
    %12 = memref.load %arg5[%c0_9] : memref<1xf32, #tpu.memory_space<smem>>
    %13 = vector.broadcast %12 : f32 to vector<8xf32>
    %14 = arith.addf %11, %13 : vector<8xf32>
    %15 = arith.negf %14 : vector<8xf32>
    %16 = math.exp %15 : vector<8xf32>
    %cst_10 = arith.constant 1.000000e+00 : f32
    %17 = vector.broadcast %cst_10 : f32 to vector<8xf32>
    %18 = arith.addf %17, %16 : vector<8xf32>
    %19 = arith.divf %17, %18 : vector<8xf32>
    %20 = vector.shape_cast %19 : vector<8xf32> to vector<1x1x8xf32>
    %c0_11 = arith.constant 0 : index
    %c0_12 = arith.constant 0 : index
    %c0_13 = arith.constant 0 : index
    %21 = vector.load %arg6[%c0_11, %c0_12, %c0_13] : memref<1x1x8xf32, #tpu.memory_space<vmem>>, vector<1x1x8xf32>
    tpu.vector_store %arg6[%c0_11, %c0_12, %c0_13], %20 {strides = array<i32>} : memref<1x1x8xf32, #tpu.memory_space<vmem>>, vector<1x1x8xf32>,
    return
  }
  func.func @transform_0(%arg0: i32) -> (i32, i32) {
    %c0_i32 = arith.constant 0 : i32
    %c0_i32_0 = arith.constant 0 : i32
    return %arg0, %c0_i32 : i32, i32
  }
  func.func @transform_1(%arg0: i32) -> (i32, i32) {
    %c0_i32 = arith.constant 0 : i32
    %c0_i32_0 = arith.constant 0 : i32
    %c0_i32_1 = arith.constant 0 : i32
    return %c0_i32, %c0_i32_0 : i32, i32
  }
  func.func @transform_2(%arg0: i32) -> (i32, i32) {
    %c0_i32 = arith.constant 0 : i32
    %c0_i32_0 = arith.constant 0 : i32
    %c0_i32_1 = arith.constant 0 : i32
    return %c0_i32, %c0_i32_0 : i32, i32
  }
  func.func @transform_3(%arg0: i32) -> (i32, i32) {
    %c0_i32 = arith.constant 0 : i32
    %c0_i32_0 = arith.constant 0 : i32
    %c0_i32_1 = arith.constant 0 : i32
    return %c0_i32, %c0_i32_0 : i32, i32
  }
  func.func @transform_4(%arg0: i32) -> i32 {
    %c0_i32 = arith.constant 0 : i32
    %c0_i32_0 = arith.constant 0 : i32
    return %c0_i32 : i32
  }
  func.func @transform_5(%arg0: i32) -> (i32, i32, i32) {
    %c0_i32 = arith.constant 0 : i32
    %c0_i32_0 = arith.constant 0 : i32
    %c0_i32_1 = arith.constant 0 : i32
    return %arg0, %c0_i32, %c0_i32_0 : i32, i32, i32
  }
}

</mosaic_0001>

<bundles_post_ra>
// kernel: tpu_custom_call.1
= control target key start
LH: loop header
LB: loop body
LE: loop exit
PB: predicated region body
PF: predicated region fallthrough
CT: control target
= control target key end

     0   :  { %vm29_vm0 = vcmask 130048   ;;  %s195_s0 = inlined_call_operand.vmem [shape: f32[8,16], index: 0, kind: input, shape index: {}]   ;;  %s196_s1 = inlined_call_operand.vmem [shape: f32[16,8], index: 1, kind: input, shape index: {}]   ;;  %s197_s2 = inlined_call_operand.vmem [shape: f32[1,8], index: 2, kind: input, shape index: {}]   ;;  %s198_s3 = inlined_call_operand.vmem [shape: f32[1,8], index: 3, kind: input, shape index: {}]   ;;  %s199_s4 = inlined_call_operand.<no memory space> [shape: f32[1], index: 4, kind: input, shape index: {}]   ;;  %s200_s5 = inlined_call_operand.hbm [shape: f32[1,1,8], index: 5, kind: output, shape index: {}]  }
   0x1   :  { %v24_v0 = vld [vmem:[%s196_s1 + $0x8] sm:$0xff]  ;;  %v23_v1 = vld [vmem:[%s196_s1] sm:$0xff] }
   0x2   :  { %47 = vmatpush.msra.mxu0 %v24_v0  ;;  %v22_v2 = vld [vmem:[%s195_s0] sm:$0xff] }
   0x3   :  { %11 = vsyncpa [#allocation4], 0  ;;  %v111_v3 = vld [vmem:[%s197_s2] ss:$0 sm:$0xff]  ;;  %vm59_vm1 = vcmask 64512   ;;  %v64_v10 = vstv %s199_s4  ;;  %v86_v19 = vlaneseq  ;;  %s143_s2 = smov [#allocation3]  }
   0x4   :  { %48 = vmatpush.msra.mxu0 %v23_v1  ;;  %v112_v6 = vld [vmem:[%s198_s3] ss:$0 sm:$0xff]  ;;  %s97_s3 = sshll.u32 %s143_s2, 4  ;;  %s99_s29 = sshll.u32 %s200_s5, 4  ;;  %vm90_vm6 = vcmask 57344   ;;  %s98_s3 = int_to_ptr.vmem [resolvable:$true] %s97_s3  ;;  %s100_s29 = int_to_ptr.hbm [resolvable:$true] %s99_s29 }
   0x5   :  { %108 = vmatmul.msk.f32.vlgmr.msra.gmra.mxu0 %vm29_vm0, %v22_v2  ;;  %v87_v24 = vand.u32 127, %v86_v19 }
  0x82   :  { %v50_v4 = vpop.f32.mrf.mxu0 }
  0x83   :  { %v51_v5 = vadd.f32 %v111_v3, %v50_v4 }
  0x85   :  { %v53_v7 = vmax.f32 %v51_v5, 0.0 }
  0x87   :  { %v58_v8 = vmul.f32 %v112_v6, %v53_v7 }
  0x89   :  { %v60_v9 = vsel %vm59_vm1, %v58_v8, 0.0 }
  0x8a   :  { %61 = vadd.xlane.f32.xlu0 %v60_v9 }
  0xfd   :  { %v62_v11 = vpop.xlane.xlu0 %61 }
  0xfe   :  { %v65_v12 = vadd.f32 %v64_v10, %v62_v11 }
 0x100   :  { %v109_v13 = vmul.f32 -1.442695, %v65_v12 }
 0x102   :  { %113 = vpow2.f32 %v109_v13 }
 0x108   :  { %v114_v14 = vpop.eup %113 }
 0x109   :  { %v69_v15 = vadd.f32 1.0, %v114_v14 }
 0x10b   :  { %115 = vrcp.f32 %v69_v15  ;;  %v81_v20 = vand.u32 2147483648, %v69_v15  ;;  %v79_v22 = vand.u32 2147483647, %v69_v15  ;;  %vm75_vm3 = vweird.f32 %v69_v15 }
 0x10d   :  { %v82_v25 = vor.u32 1.1754944e-38, %v81_v20  ;;  %vm80_vm5 = vcmp.eq.f32.partialorder %v79_v22, 8.507059e+37 }
 0x111   :  { %v116_v16 = vpop.eup %115 }
 0x112   :  { %v71_v17 = vmul.f32 %v116_v16, %v69_v15  ;;  %vm76_vm2 = vweird.f32 %v116_v16 }
 0x113   :  { %vm77_vm4 = vmor %vm75_vm3, %vm76_vm2 }
 0x114   :  { %v72_v18 = vsub.f32 1.0, %v71_v17 }
 0x116   :  { %v73_v21 = vmul.f32 %v116_v16, %v72_v18 }
 0x118   :  { %v74_v23 = vadd.f32 %v116_v16, %v73_v21 }
 0x11a   :  { %v78_v26 = vsel %vm77_vm4, %v116_v16, %v74_v23 }
 0x11b   :  { %v83_v27 = vsel %vm80_vm5, %v82_v25, %v78_v26 }
 0x11c   :  { %v88_v28 = vperm.slane %v83_v27, %v87_v24 }
 0x11e   :  { %91 = vst.msk [vmem:[#allocation3] sm:$0x1] %vm90_vm6, %v88_v28 }
 0x11f   :  { %102 = dma.vmem_to_hbm [thread:$0]  %s98_s3, 16, %s100_s29, [#allocation4]  }
 0x120   :  { %141 = dma.done.wait [#allocation4], 16  }
 0x121   :  { %142 = vsyncadd [#allocation4], 4294967280 }
 0x122   :  { %107 = vsyncpa [#allocation4], 1 }

</bundles_post_ra>
